<compile_context>
chip_gen: v5e
topology: v5e:2x2
jax: 0.10.0
libtpu: 0.0.40
codegen_flags: <defaults>
</compile_context>

<pallas_src>
import jax
import jax.numpy as jnp
from jax import lax
from jax.experimental import pallas as pl
from jax.experimental.pallas import tpu as pltpu


def _round_up(x, m):
    return ((x + m - 1) // m) * m


def _make_kernel(B, tile_b, chunk, D):
    """Kernel computing one (8, D) f32 partial sum of squared error per block."""
    num_chunks = tile_b // chunk

    def kernel(pred_ref, label_ref, mean_ref, std_ref, out_ref):
        i = pl.program_id(0)
        rows_valid = B - i * tile_b          # rows of this tile that are in-bounds
        std = std_ref[...]                   # (1, D) f32, broadcasts over rows
        mean = mean_ref[...]                 # (1, D) f32

        def body(c, acc):
            r0 = pl.multiple_of(c * chunk, chunk)
            pred = pred_ref[pl.ds(r0, chunk), :].astype(jnp.float32)
            label = label_ref[pl.ds(r0, chunk), :].astype(jnp.float32)
            diff = pred * std + mean - label               # denormalize + error
            sq = diff * diff
            # Mask rows past the (static) batch size; OOB rows of the ragged
            # last block contain undefined data, so select (not multiply).
            row_ids = lax.broadcasted_iota(jnp.int32, (chunk, D), 0) + r0
            sq = jnp.where(row_ids < rows_valid, sq, 0.0)
            # Fold the chunk onto a vreg-shaped (8, D) partial with pure VPU
            # sublane-group adds (no cross-lane reduce inside the kernel).
            return acc + jnp.sum(sq.reshape(chunk // 8, 8, D), axis=0)

        acc = lax.fori_loop(0, num_chunks, body,
                            jnp.zeros((8, D), jnp.float32),
                            unroll=num_chunks <= 8)
        out_ref[0] = acc

    return kernel


def _choose_tiling(B, D, itemsize, *, target_in_buf_bytes=4 << 20,
                   vmem_cap_bytes=40 << 20, chunk_rows=512):
    """Pick (tile_b, chunk, vmem_estimate) sized by bytes, within the VMEM cap."""
    B8 = _round_up(B, 8)
    tile_b = max(8, (target_in_buf_bytes // (itemsize * D)) // 8 * 8)
    tile_b = min(tile_b, B8)
    # v7x has 2 TensorCores: if one block would swallow the batch, split it.
    if tile_b >= B8 and B8 >= 16:
        tile_b = max(8, _round_up((B + 1) // 2, 8))

    def vmem_estimate(tb):
        ch = min(chunk_rows, tb)
        in_bufs = 2 * 2 * tb * D * itemsize     # 2 inputs x double buffer
        out_bufs = 2 * 8 * D * 4                # (8, D) f32 partial x double buffer
        consts = 2 * 2 * D * 4                  # mean/std (resident, double buffered)
        temps = 4 * ch * D * 4                  # per-chunk f32 upcasts / diff / sq
        acc = 8 * D * 4
        return in_bufs + out_bufs + consts + temps + acc

    while tile_b > 8 and vmem_estimate(tile_b) > vmem_cap_bytes:
        tile_b = max(8, (tile_b // 2) // 8 * 8)

    chunk = min(chunk_rows, tile_b)
    tile_b = (tile_b // chunk) * chunk          # chunk must divide tile_b
    return tile_b, chunk, vmem_estimate(tile_b)


def static_denormalized_mse(pred_pose_norm, label_pose, pose_mean, pose_std):
    """loss = mean((pred_pose_norm * pose_std + pose_mean - label_pose) ** 2)"""
    B, D = pred_pose_norm.shape
    total_elems = B * D

    mean = pose_mean.reshape(1, D).astype(jnp.float32)
    std = pose_std.reshape(1, D).astype(jnp.float32)

    itemsize = max(pred_pose_norm.dtype.itemsize, label_pose.dtype.itemsize)
    tile_b, chunk, vmem_est = _choose_tiling(B, D, itemsize)
    num_blocks = pl.cdiv(B, tile_b)
    vmem_limit = int(min(48 << 20, vmem_est + (4 << 20)))

    partials = pl.pallas_call(
        _make_kernel(B, tile_b, chunk, D),
        out_shape=jax.ShapeDtypeStruct((num_blocks, 8, D), jnp.float32),
        grid=(num_blocks,),
        in_specs=[
            pl.BlockSpec((tile_b, D), lambda i: (i, 0)),   # pred  (native dtype)
            pl.BlockSpec((tile_b, D), lambda i: (i, 0)),   # label (native dtype)
            pl.BlockSpec((1, D), lambda i: (0, 0)),        # mean  (resident)
            pl.BlockSpec((1, D), lambda i: (0, 0)),        # std   (resident)
        ],
        out_specs=pl.BlockSpec((1, 8, D), lambda i: (i, 0, 0)),
        compiler_params=pltpu.CompilerParams(
            dimension_semantics=("parallel",),
            vmem_limit_bytes=vmem_limit),
    )(pred_pose_norm, label_pose, mean, std)

    # Tiny final reduction + mean outside the kernel.
    return jnp.sum(partials) * jnp.float32(1.0 / total_elems)


def static_denormalized_loss(preds, labels, key="pose"):
    """Dict-based interface mirroring the PyTorch module's forward()."""
    return static_denormalized_mse(
        preds[key], labels[key], labels["pose_mean"], labels["pose_std"])


if __name__ == "__main__":
    key = jax.random.PRNGKey(0)

    # ---- test 1: lane-aligned shapes (D multiple of 128) ---------------------
    B, D = 16, 128
    k0, k1, k2, k3, k4 = jax.random.split(key, 5)
    pred = jax.random.normal(k0, (B, D), dtype=jnp.float32)
    label = jax.random.normal(k1, (B, D), dtype=jnp.float32) * 2.0 + 0.3
    mean = jax.random.normal(k2, (1, D), dtype=jnp.float32) * 0.5
    std = jnp.abs(jax.random.normal(k3, (1, D), dtype=jnp.float32)) + 0.5

    preds = {"pose": pred}
    labels = {"pose": label, "pose_mean": mean, "pose_std": std}
    loss = jax.block_until_ready(static_denormalized_loss(preds, labels))
    ref = jnp.mean((pred * std + mean - label) ** 2)
    assert jnp.allclose(loss, ref, rtol=1e-5, atol=1e-5), (loss, ref)

    # ---- test 2: ragged pose shapes (B=10, D=51), no wrapper padding ---------
    B2, D2 = 10, 51
    k5, k6, k7, k8, k9 = jax.random.split(k4, 5)
    pred2 = jax.random.normal(k5, (B2, D2), dtype=jnp.float32)
    label2 = jax.random.normal(k6, (B2, D2), dtype=jnp.float32)
    mean2 = jax.random.normal(k7, (1, D2), dtype=jnp.float32) * 0.5
    std2 = jnp.abs(jax.random.normal(k8, (1, D2), dtype=jnp.float32)) + 0.5

    loss2 = jax.block_until_ready(
        static_denormalized_mse(pred2, label2, mean2, std2))
    ref2 = jnp.mean((pred2 * std2 + mean2 - label2) ** 2)
    assert jnp.allclose(loss2, ref2, rtol=1e-5, atol=1e-5), (loss2, ref2)

    # ---- test 3: bf16 pred/label (native dtype streamed, f32 math in-kernel) -
    B3, D3 = 24, 51
    ka, kb = jax.random.split(k9, 2)
    pred3 = jax.random.normal(ka, (B3, D3), dtype=jnp.float32).astype(jnp.bfloat16)
    label3 = jax.random.normal(kb, (B3, D3), dtype=jnp.float32).astype(jnp.bfloat16)

    loss3 = jax.block_until_ready(
        static_denormalized_mse(pred3, label3, mean2[:, :D3], std2[:, :D3]))
    ref3 = jnp.mean((pred3.astype(jnp.float32) * std2[:, :D3] + mean2[:, :D3]
                     - label3.astype(jnp.float32)) ** 2)
    assert jnp.allclose(loss3, ref3, rtol=1e-4, atol=1e-4), (loss3, ref3)

    print("KERNEL_OK")
</pallas_src>

<mosaic_0001>
module attributes {stable_mosaic.version = 11 : i64} {
  func.func @kernel(%arg0: i32, %arg1: memref<8x128xf32, #tpu.memory_space<vmem>>, %arg2: memref<8x128xf32, #tpu.memory_space<vmem>>, %arg3: memref<1x128xf32, #tpu.memory_space<vmem>>, %arg4: memref<1x128xf32, #tpu.memory_space<vmem>>, %arg5: memref<1x8x128xf32, #tpu.memory_space<vmem>>) attributes {dimension_semantics = [#tpu.dimension_semantics<parallel>], iteration_bounds = array<i64: 2>, scalar_prefetch = 0 : i64, scratch_operands = 0 : i64, tpu.core_type = #tpu.core_type<tc>, window_params = [{transform_indices = @transform_0, window_bounds = array<i64: 8, 128>}, {transform_indices = @transform_1, window_bounds = array<i64: 8, 128>}, {pipeline_mode = #tpu.pipeline_mode<synchronous>, transform_indices = @transform_2, window_bounds = array<i64: 1, 128>}, {pipeline_mode = #tpu.pipeline_mode<synchronous>, transform_indices = @transform_3, window_bounds = array<i64: 1, 128>}, {transform_indices = @transform_4, window_bounds = array<i64: 1, 8, 128>}]} {
    %c8_i32 = arith.constant 8 : i32
    %0 = arith.muli %arg0, %c8_i32 : i32
    %c16_i32 = arith.constant 16 : i32
    %1 = arith.subi %c16_i32, %0 : i32
    %c0 = arith.constant 0 : index
    %c0_0 = arith.constant 0 : index
    %2 = vector.load %arg4[%c0, %c0_0] : memref<1x128xf32, #tpu.memory_space<vmem>>, vector<1x128xf32>
    %c0_1 = arith.constant 0 : index
    %c0_2 = arith.constant 0 : index
    %3 = vector.load %arg3[%c0_1, %c0_2] : memref<1x128xf32, #tpu.memory_space<vmem>>, vector<1x128xf32>
    %cst = arith.constant 0.000000e+00 : f32
    %4 = vector.broadcast %cst : f32 to vector<8x128xf32>
    %c0_i32 = arith.constant 0 : i32
    %c8_i32_3 = arith.constant 8 : i32
    %5 = arith.muli %c0_i32, %c8_i32_3 : i32
    %6 = tpu.assume_multiple %5, 8 : i32
    %7 = arith.index_cast %6 : i32 to index
    %c0_4 = arith.constant 0 : index
    %8 = vector.load %arg1[%7, %c0_4] : memref<8x128xf32, #tpu.memory_space<vmem>>, vector<8x128xf32>
    %9 = arith.index_cast %6 : i32 to index
    %c0_5 = arith.constant 0 : index
    %10 = vector.load %arg2[%9, %c0_5] : memref<8x128xf32, #tpu.memory_space<vmem>>, vector<8x128xf32>
    %11 = vector.broadcast %2 : vector<1x128xf32> to vector<8x128xf32>
    %12 = arith.mulf %8, %11 : vector<8x128xf32>
    %13 = vector.broadcast %3 : vector<1x128xf32> to vector<8x128xf32>
    %14 = arith.addf %12, %13 : vector<8x128xf32>
    %15 = arith.subf %14, %10 : vector<8x128xf32>
    %16 = arith.mulf %15, %15 : vector<8x128xf32>
    %17 = tpu.iota {dimensions = array<i32: 0>} : vector<8x128xi32>
    %18 = vector.broadcast %6 : i32 to vector<8x128xi32>
    %19 = arith.addi %17, %18 : vector<8x128xi32>
    %20 = vector.broadcast %1 : i32 to vector<8x128xi32>
    %21 = arith.cmpi slt, %19, %20 : vector<8x128xi32>
    %cst_6 = arith.constant 0.000000e+00 : f32
    %22 = vector.broadcast %cst_6 : f32 to vector<8x128xf32>
    %23 = arith.select %21, %16, %22 : vector<8x128xi1>, vector<8x128xf32>
    %24 = vector.shape_cast %23 : vector<8x128xf32> to vector<1x8x128xf32>
    %cst_7 = arith.constant dense<0.000000e+00> : vector<8x128xf32>
    %25 = vector.multi_reduction <add>, %24, %cst_7 [0] : vector<1x8x128xf32> to vector<8x128xf32>
    %26 = arith.addf %4, %25 : vector<8x128xf32>
    %c1_i32 = arith.constant 1 : i32
    %c0_8 = arith.constant 0 : index
    %c0_9 = arith.constant 0 : index
    %c0_10 = arith.constant 0 : index
    %27 = vector.load %arg5[%c0_8, %c0_9, %c0_10] : memref<1x8x128xf32, #tpu.memory_space<vmem>>, vector<1x8x128xf32>
    %28 = vector.shape_cast %27 : vector<1x8x128xf32> to vector<8x128xf32>
    %29 = vector.shape_cast %26 : vector<8x128xf32> to vector<1x8x128xf32>
    tpu.vector_store %arg5[%c0_8, %c0_9, %c0_10], %29 {strides = array<i32>} : memref<1x8x128xf32, #tpu.memory_space<vmem>>, vector<1x8x128xf32>,
    return
  }
  func.func @transform_0(%arg0: i32) -> (i32, i32) {
    %c0_i32 = arith.constant 0 : i32
    %c0_i32_0 = arith.constant 0 : i32
    return %arg0, %c0_i32 : i32, i32
  }
  func.func @transform_1(%arg0: i32) -> (i32, i32) {
    %c0_i32 = arith.constant 0 : i32
    %c0_i32_0 = arith.constant 0 : i32
    return %arg0, %c0_i32 : i32, i32
  }
  func.func @transform_2(%arg0: i32) -> (i32, i32) {
    %c0_i32 = arith.constant 0 : i32
    %c0_i32_0 = arith.constant 0 : i32
    %c0_i32_1 = arith.constant 0 : i32
    return %c0_i32, %c0_i32_0 : i32, i32
  }
  func.func @transform_3(%arg0: i32) -> (i32, i32) {
    %c0_i32 = arith.constant 0 : i32
    %c0_i32_0 = arith.constant 0 : i32
    %c0_i32_1 = arith.constant 0 : i32
    return %c0_i32, %c0_i32_0 : i32, i32
  }
  func.func @transform_4(%arg0: i32) -> (i32, i32, i32) {
    %c0_i32 = arith.constant 0 : i32
    %c0_i32_0 = arith.constant 0 : i32
    %c0_i32_1 = arith.constant 0 : i32
    return %arg0, %c0_i32, %c0_i32_0 : i32, i32, i32
  }
}

</mosaic_0001>

<bundles_post_ra>
// kernel: tpu_custom_call.1
= control target key start
LH: loop header
LB: loop body
LE: loop exit
PB: predicated region body
PF: predicated region fallthrough
CT: control target
= control target key end

     0   :  { %s786_s0 = inlined_call_operand.hbm [shape: f32[16,128], index: 0, kind: input, shape index: {}]   ;;  %s787_s1 = inlined_call_operand.hbm [shape: f32[16,128], index: 1, kind: input, shape index: {}]   ;;  %s788_s2 = inlined_call_operand.vmem [shape: f32[1,128], index: 2, kind: input, shape index: {}]   ;;  %s789_s3 = inlined_call_operand.vmem [shape: f32[1,128], index: 3, kind: input, shape index: {}]   ;;  %s790_s4 = inlined_call_operand.hbm [shape: f32[2,8,128], index: 4, kind: output, shape index: {}]  }
   0x1   :  { %791 = sst [smem:[#allocation11_spill]] %s786_s0 }
   0x2   :  { %9 = vsyncpa [#allocation3], 0 }
   0x3   :  { %11 = vsyncpa [#allocation3 + $0x1], 0 }
   0x4   :  { %12 = vsyncpa [#allocation6], 0 }
   0x5   :  { %14 = vsyncpa [#allocation6 + $0x1], 0 }
   0x6   :  { %15 = vsyncpa [#allocation4], 0 }
   0x7   :  { %17 = vsyncpa [#allocation4 + $0x1], 0  ;;  %s615_s15 = smov 0   ;;  %s617_s16 = smov 0  }
   0x8   :  { %s619_s17 = smov 0   ;;  %s621_s18 = smov 0  }
   0x9 LB: > { %s636_s19 = sadd.s32 4294967295, %s588_s18   ;;  %s389_s20 = sadd.s32 4294967294, %s588_s18   ;;  %s588_s18 = sphi %s621_s18, %s803_s18   ;;  %s584_s17 = sphi %s619_s17, %s802_s17   ;;  %s580_s16 = sphi %s617_s16, %s801_s16   ;;  %s576_s15 = sphi %s615_s15, %s800_s15  }
   0xa   : > { %s640_s21 = sadd.s32 1, %s588_s18   ;;  %s30_s22 = sadd.s32 1, %s584_s17 }
   0xb   : > { %s27_s23 = ssub.s32 %s588_s18, %s640_s21  ;;  %p37_p0 = scmp.ne.s32.totalorder %s584_s17, %s580_s16 }
   0xc   : > { %p28_p1 = scmp.eq.s32.totalorder %s27_s23, 0  ;;  %p38_p2 = scmp.eq.s32.totalorder %s588_s18, 0 }
   0xd   : > { %p43_p3 = scmp.ne.s32.totalorder %s580_s16, %s576_s15  ;;  %p44_p4 = scmp.eq.s32.totalorder %s636_s19, 0 }
   0xe   : > { %s652_s24 = scalar_select %p28_p1, %s584_s17, %s30_s22  }
   0xf   : > { %p654_p5 = por %p38_p2, %p37_p0  ;;  %p658_p6 = por %p44_p4, %p43_p3 }
  0x10   : > { %p135_p7 = scmp.eq.s32.totalorder %s636_s19, 1  ;;  %p141_p8 = scmp.eq.s32.totalorder %s389_s20, 1 }
  0x11   : > { %p422_p10 = scmp.lt.s32.totalorder %s588_s18, 2  ;;  %s674_s29 = sand.u32 1, %s584_s17  }
  0x12   : > { %p665_p11 = por %p135_p7, %p37_p0  ;;  %p669_p12 = por %p141_p8, %p43_p3 }
  0x13   : > { %s393_s30 = sshll.u32 %s588_s18, 3  ;;  %s392_s5 = sshll.u32 %s674_s29, 3 }
  0x14   : > { %s796_s0 = sld [smem:[#allocation11_spill]]  ;;  %s171_s10 = scalar_lea.vmem [#allocation2], %s392_s5 }
  0x15   : > { %s179_s11 = sshll.u32 %s171_s10, 4  ;;  %p683_p13 = pnand %p422_p10, %p654_p5  ;;  %s180_s11 = int_to_ptr.vmem [resolvable:$true] %s179_s11 }
  0x16   : > { %p396_p0 = scmp.ge.s32.totalorder %s588_s18, 1  ;;  %p203_p1 = scmp.lt.s32.totalorder %s588_s18, 3 }
  0x17   : > { %s168_s13 = scalar_lea.sflag [#allocation3], %s674_s29  ;;  %p462_p3 = pneg %p683_p13 }
  0x1a   : > { %s175_s8 = scalar_lea.hbm %s796_s0, %s393_s30  ;;  %s465_s25 = scalar_lea.hbm %s796_s0, 16 }
  0x1b   : > { %s177_s9 = sshll.u32 %s175_s8, 4  ;;  %s178_s9 = int_to_ptr.hbm [resolvable:$true] %s177_s9 }
  0x1c   : > { %s458_s14 = sshra.s32 %s178_s9, 4  ;;  %s459_s14 = int_to_ptr.hbm [resolvable:$true] %s458_s14 }
  0x1d   : > { %s460_s20 = scalar_lea.hbm %s459_s14, 8  ;;  %p466_p5 = scmp.lt.s32.totalorder %s459_s14, %s796_s0 }
  0x1e   : > { %p461_p2 = scmp.ne.s32.totalorder %s459_s14, %s460_s20  ;;  %p467_p8 = scmp.lt.s32.totalorder %s465_s25, %s460_s20 }
  0x20   : > { %p463_p4 = pnand %p462_p3, %p461_p2  ;;  %p468_p10 = por %p467_p8, %p466_p5 }
  0x22   : > { %p464_p7 = pneg %p463_p4 }
  0x24   : > { %p469_p9 = pnand %p468_p10, %p464_p7 }
  0x26   : > { %472 = shalt.err (!%p469_p9)
}
  0x27   : > { %414 = dma.hbm_to_vmem [thread:$0]  (!%p683_p13), %s178_s9, 128, %s180_s11, %s168_s13  }
  0x28   : > { %p707_p2 = pnand %p396_p0, %p203_p1  ;;  %s194_s14 = scalar_lea.hbm %s787_s1, %s393_s30 }
  0x29   : > { %s196_s20 = sshll.u32 %s194_s14, 4  ;;  %s190_s23 = scalar_lea.vmem [#allocation5], %s392_s5  ;;  %s197_s20 = int_to_ptr.hbm [resolvable:$true] %s196_s20 }
  0x2a   : > { %s198_s25 = sshll.u32 %s190_s23, 4  ;;  %s187_s6 = scalar_lea.sflag [#allocation6], %s674_s29  ;;  %s199_s25 = int_to_ptr.vmem [resolvable:$true] %s198_s25 }
  0x2b   : > { %s488_s7 = sshra.s32 %s197_s20, 4  ;;  %s495_s13 = scalar_lea.hbm %s787_s1, 16  ;;  %s489_s7 = int_to_ptr.hbm [resolvable:$true] %s488_s7 }
  0x2c   : > { %s490_s0 = scalar_lea.hbm %s489_s7, 8  ;;  %p496_p4 = scmp.lt.s32.totalorder %s489_s7, %s787_s1 }
  0x2d   : > { %p491_p9 = scmp.ne.s32.totalorder %s489_s7, %s490_s0  ;;  %p497_p7 = scmp.lt.s32.totalorder %s495_s13, %s490_s0 }
  0x2f   : > { %p493_p0 = pnand %p491_p9, %p462_p3  ;;  %p498_p5 = por %p497_p7, %p496_p4 }
  0x31   : > { %p494_p1 = pneg %p493_p0 }
  0x33   : > { %p499_p8 = pnand %p498_p5, %p494_p1 }
  0x35   : > { %502 = shalt.err (!%p499_p8)
}
  0x36   : > { %417 = dma.hbm_to_vmem [thread:$0]  (!%p683_p13), %s197_s20, 128, %s199_s25, %s187_s6  }
  0x37   : > { %207 = sbr.rel (%p707_p2) target bundleno = 78 (0x4e), region = 36  ;;  %s729_s29 = sand.u32 (!%p707_p2), 1, %s580_s16  }
  0x38   : > { %s732_s5 = sshll.u32 (!%p707_p2), %s729_s29, 3  ;;  %s210_s22 = scalar_lea.sflag (!%p707_p2), [#allocation3], %s729_s29 }
  0x39   : > { %s213_s0 = scalar_lea.vmem (!%p707_p2), [#allocation2], %s732_s5 }
  0x3c   : > { %563 = dma.done.wait (%p658_p6), %s210_s22, 128  }
  0x3d   : > { %565 = vsyncadd (%p658_p6), %s210_s22, 4294967168  ;;  %s220_s12 = scalar_lea.sflag [#allocation6], %s729_s29  ;;  %s223_s8 = scalar_lea.vmem [#allocation5], %s732_s5 }
  0x3e   : > { %567 = dma.done.wait (%p658_p6), %s220_s12, 128  }
  0x3f   : > { %569 = vsyncadd (%p658_p6), %s220_s12, 4294967168  ;;  %s400_s14 = sshll.u32 %s636_s19, 3  ;;  %v258_v0 = vld [vmem:[%s213_s0] sm:$0xff]  ;;  %v270_v1 = vlaneseq  ;;  %v259_v5 = vld [vmem:[%s223_s8] sm:$0xff]  ;;  %s253_s19 = scalar_lea.vmem [#allocation7], %s732_s5 }
  0x40   : > { %v456_v2 = vld [vmem:[%s789_s3] ss:$0 sm:$0xff]  ;;  %s255_s7 = ssub.s32 16, %s400_s14  ;;  %s291_s11 = scalar_lea.hbm %s790_s4, %s400_s14 }
  0x41   : > { %v457_v3 = vld [vmem:[%s788_s2] ss:$0 sm:$0xff]  ;;  %v263_v4 = vmul.f32 %v456_v2, %v258_v0  ;;  %v271_v6 = vshrl.u32 %v270_v1, 7  ;;  %v274_v8 = vstv %s255_s7  ;;  %s293_s13 = sshll.u32 %s253_s19, 4  ;;  %s295_s10 = sshll.u32 %s291_s11, 4  ;;  %s294_s13 = int_to_ptr.vmem [resolvable:$true] %s293_s13  ;;  %s296_s10 = int_to_ptr.hbm [resolvable:$true] %s295_s10 }
  0x42   : > { %s281_s30 = scalar_lea.sflag [#allocation4], %s729_s29  ;;  %s532_s22 = sshra.s32 %s296_s10, 4  ;;  %s533_s22 = int_to_ptr.hbm [resolvable:$true] %s532_s22 }
  0x43   : > { %v267_v7 = vadd.f32 %v457_v3, %v263_v4  ;;  %vm275_vm0 = vcmp.lt.s32.totalorder %v271_v6, %v274_v8  ;;  %s534_s0 = scalar_lea.hbm %s533_s22, 8  ;;  %s538_s5 = scalar_lea.hbm %s790_s4, 16 }
  0x44   : > { %p535_p6 = scmp.ne.s32.totalorder %s533_s22, %s534_s0  ;;  %p539_p10 = scmp.lt.s32.totalorder %s533_s22, %s790_s4 }
  0x45   : > { %v268_v9 = vsub.f32 %v267_v7, %v259_v5  ;;  %p540_p2 = scmp.lt.s32.totalorder %s538_s5, %s534_s0 }
  0x46   : > { %p536_p13 = pnand %p535_p6, %p665_p11 }
  0x47   : > { %v269_v10 = vmul.f32 %v268_v9, %v268_v9  ;;  %p541_p9 = por %p540_p2, %p539_p10 }
  0x48   : > { %p537_p3 = pneg %p536_p13 }
  0x49   : > { %v276_v11 = vsel %vm275_vm0, %v269_v10, 0.0 }
  0x4a   : > { %279 = vst [vmem:[%s253_s19] sm:$0xff] %v276_v11  ;;  %p542_p0 = pnand %p541_p9, %p537_p3 }
  0x4c   : > { %545 = shalt.err (!%p542_p0)
}
  0x4d   : > { %409 = dma.vmem_to_hbm [thread:$0]  (%p665_p11), %s294_s13, 128, %s296_s10, %s281_s30  }
  0x4e PF: > { %s307_s29 = sand.u32 1, %s576_s15   ;;  %p799_p1 = scmp.ge.s32.totalorder %s588_s18, 2 }
  0x4f   : > { %s308_s23 = scalar_lea.sflag [#allocation4], %s307_s29 }
  0x50   : > { %p419_p4 = pnand %p799_p1, %p669_p12 }
  0x52   : > { %p420_p7 = pneg %p419_p4 }
  0x54   : > { %571 = dma.done.wait (%p420_p7), %s308_s23, 128  }
  0x55   : > { %573 = vsyncadd (%p420_p7), %s308_s23, 4294967168  ;;  %p20_p5 = scmp.ge.s32.totalorder %s640_s21, 4   ;;  %s800_s15 = smov %s580_s16 }
  0x56   : > { %s801_s16 = smov %s584_s17  ;;  %s802_s17 = smov %s652_s24 }
  0x57   : > { %s803_s18 = smov %s640_s21  ;;  %22 = sbr.rel (!%p20_p5) target bundleno = 9 (0x9), region = 94 }
  0x5c   :  { %314 = vsyncpa [#allocation3], 1 }
  0x5d   :  { %316 = vsyncpa [#allocation3 + $0x1], 1 }
  0x5e   :  { %317 = vsyncpa [#allocation6], 1 }
  0x5f   :  { %319 = vsyncpa [#allocation6 + $0x1], 1 }
  0x60   :  { %320 = vsyncpa [#allocation4], 1 }
  0x61   :  { %322 = vsyncpa [#allocation4 + $0x1], 1 }

</bundles_post_ra>
